<compile_context>
chip_gen: v5e
topology: v5e:2x2
jax: 0.10.0
libtpu: 0.0.40
codegen_flags: <defaults>
</compile_context>

<pallas_src>
import functools

import jax
import jax.numpy as jnp
from jax.experimental import pallas as pl
from jax.experimental.pallas import tpu as pltpu

_LANE = 128
# Per-streamed-block budget (bytes). The x-in and out blocks are double-buffered
# by the Pallas pipeline, so the working set is ~4x this — comfortably inside the
# 16 MiB scoped-VMEM default of v5e and far below v7x's 64 MiB physical VMEM.
_MAX_BLOCK_BYTES = 2 * 1024 * 1024


def _layernorm_affine_kernel(x_ref, w_ref, b_ref, o_ref, *, eps: float):
    # x_ref block: (bB, C, tT); w_ref / b_ref: (1, C, 1) f32, VMEM-resident.
    x = x_ref[...].astype(jnp.float32)
    mu = jnp.mean(x, axis=1, keepdims=True)                 # (bB, 1, tT)
    res = x - mu
    sigma = jnp.mean(res * res, axis=1, keepdims=True)      # biased variance
    out = res * jax.lax.rsqrt(sigma + eps)
    out = out * w_ref[...] + b_ref[...]
    o_ref[...] = out.astype(o_ref.dtype)


def _layernorm_plain_kernel(x_ref, o_ref, *, eps: float):
    # affine=False path: no scale/shift, no synthesized ones/zeros params.
    x = x_ref[...].astype(jnp.float32)
    mu = jnp.mean(x, axis=1, keepdims=True)
    res = x - mu
    sigma = jnp.mean(res * res, axis=1, keepdims=True)
    o_ref[...] = (res * jax.lax.rsqrt(sigma + eps)).astype(o_ref.dtype)


def _pick_lane_tile(T: int, c_row_bytes: int) -> int:
    """Largest lane tile (multiple of 128) within the per-block VMEM budget."""
    max_lanes = max(1, (_MAX_BLOCK_BYTES // max(c_row_bytes, 1)) // _LANE)
    max_lanes = min(max_lanes, 16)            # cap at 2048 lanes (diminishing returns)
    if T % _LANE == 0:
        # biggest multiple of 128 that *divides* T -> no padding / no copy needed
        n = T // _LANE
        for m in range(min(n, max_lanes), 0, -1):
            if n % m == 0:
                return m * _LANE
        return _LANE
    # ragged T: tile the padded-to-128 extent (wrapper pads, then slices back)
    return min(max_lanes, pl.cdiv(T, _LANE)) * _LANE


def _pick_batch_tile(B: int, block_bytes: int) -> int:
    """Fold batches into one block to amortize the ~0.35us/step grid overhead."""
    max_b = max(1, _MAX_BLOCK_BYTES // max(block_bytes, 1))
    for nb in range(min(B, max_b), 0, -1):    # largest divisor of B -> no padding
        if B % nb == 0:
            return nb
    return 1


def layernorm_bct(x, weight=None, bias=None, eps=1e-5):
    """LayerNorm over dim=1 (channels) of x with shape (B, C, T)."""
    B, C, T = x.shape
    itemsize = jnp.dtype(x.dtype).itemsize

    tT = _pick_lane_tile(T, C * itemsize)
    bB = _pick_batch_tile(B, C * tT * itemsize)

    # Pad T up to a multiple of the lane tile if needed (benign: the reduction is
    # per-(b, t) column, padded columns are sliced off below). For lane-aligned T
    # the tile divides T exactly, so no pad/copy happens on the common large case.
    Tp = pl.cdiv(T, tT) * tT
    xp = x if Tp == T else jnp.pad(x, ((0, 0), (0, 0), (0, Tp - T)))

    grid = (B // bB, Tp // tT)
    x_spec = pl.BlockSpec((bB, C, tT), lambda i, j: (i, 0, j))

    if weight is not None:
        w = jnp.asarray(weight, jnp.float32).reshape(1, C, 1)
        b = jnp.asarray(bias, jnp.float32).reshape(1, C, 1)
        kernel = functools.partial(_layernorm_affine_kernel, eps=eps)
        in_specs = [
            x_spec,
            pl.BlockSpec((1, C, 1), lambda i, j: (0, 0, 0)),   # weight (resident)
            pl.BlockSpec((1, C, 1), lambda i, j: (0, 0, 0)),   # bias   (resident)
        ]
        args = (xp, w, b)
    else:
        kernel = functools.partial(_layernorm_plain_kernel, eps=eps)
        in_specs = [x_spec]
        args = (xp,)

    out = pl.pallas_call(
        kernel,
        out_shape=jax.ShapeDtypeStruct((B, C, Tp), x.dtype),
        grid_spec=pltpu.PrefetchScalarGridSpec(
            num_scalar_prefetch=0,
            grid=grid,
            in_specs=in_specs,
            out_specs=pl.BlockSpec((bB, C, tT), lambda i, j: (i, 0, j)),
        ),
        compiler_params=pltpu.CompilerParams(
            dimension_semantics=("parallel", "parallel"),
        ),
    )(*args)

    return out if Tp == T else out[:, :, :T]


class LayerNormPallas:
    """Mirror of the PyTorch LayerNorm(num_channels, eps, affine) module."""

    def __init__(self, num_channels, eps=1e-5, affine=True, dtype=jnp.float32):
        self.num_channels = num_channels
        self.eps = eps
        self.affine = affine
        if self.affine:
            # Deterministic init, same as the nn.Module __init__: ones / zeros.
            self.weight = jnp.ones((1, num_channels, 1), dtype=dtype)
            self.bias = jnp.zeros((1, num_channels, 1), dtype=dtype)
        else:
            self.weight = None
            self.bias = None

    def __call__(self, x):
        assert x.ndim == 3
        assert x.shape[1] == self.num_channels
        # I/O stays in the caller's dtype (bf16 in flows through untouched);
        # the reduction is done in f32 inside the kernel.
        return layernorm_bct(x, self.weight, self.bias, eps=self.eps)


if __name__ == "__main__":
    key = jax.random.PRNGKey(0)
    B, C, T = 2, 4, 16
    x = jax.random.normal(key, (B, C, T), dtype=jnp.float32)

    # Reference in plain JAX (same math as the PyTorch forward).
    mu = jnp.mean(x, axis=1, keepdims=True)
    res = x - mu
    sigma = jnp.mean(res ** 2, axis=1, keepdims=True)
    ref_plain = res / jnp.sqrt(sigma + 1e-5)

    # affine=True path
    ln = LayerNormPallas(num_channels=C, eps=1e-5, affine=True)
    out = jax.block_until_ready(ln(x))
    ref = ref_plain * ln.weight + ln.bias
    assert out.shape == (B, C, T)
    assert jnp.allclose(out, ref, atol=1e-5, rtol=1e-5)

    # affine=False path (dedicated kernel variant, no scale/shift work)
    ln_na = LayerNormPallas(num_channels=C, eps=1e-5, affine=False)
    out_na = jax.block_until_ready(ln_na(x))
    assert jnp.allclose(out_na, ref_plain, atol=1e-5, rtol=1e-5)

    print("KERNEL_OK")
</pallas_src>

<mosaic_0001>
module attributes {stable_mosaic.version = 11 : i64} {
  func.func @_layernorm_affine_kernel(%arg0: i32, %arg1: i32, %arg2: memref<2x4x128xf32, #tpu.memory_space<vmem>>, %arg3: memref<1x4x1xf32, #tpu.memory_space<vmem>>, %arg4: memref<1x4x1xf32, #tpu.memory_space<vmem>>, %arg5: memref<2x4x128xf32, #tpu.memory_space<vmem>>) attributes {dimension_semantics = [#tpu.dimension_semantics<parallel>, #tpu.dimension_semantics<parallel>], iteration_bounds = array<i64: 1, 1>, scalar_prefetch = 0 : i64, scratch_operands = 0 : i64, tpu.core_type = #tpu.core_type<tc>, window_params = [{transform_indices = @transform_0, window_bounds = array<i64: 2, 4, 128>}, {pipeline_mode = #tpu.pipeline_mode<synchronous>, transform_indices = @transform_1, window_bounds = array<i64: 1, 4, 1>}, {pipeline_mode = #tpu.pipeline_mode<synchronous>, transform_indices = @transform_2, window_bounds = array<i64: 1, 4, 1>}, {transform_indices = @transform_3, window_bounds = array<i64: 2, 4, 128>}]} {
    %c0 = arith.constant 0 : index
    %c0_0 = arith.constant 0 : index
    %c0_1 = arith.constant 0 : index
    %0 = vector.load %arg2[%c0, %c0_0, %c0_1] : memref<2x4x128xf32, #tpu.memory_space<vmem>>, vector<2x4x128xf32>
    %cst = arith.constant dense<0.000000e+00> : vector<2x128xf32>
    %1 = vector.multi_reduction <add>, %0, %cst [1] : vector<2x4x128xf32> to vector<2x128xf32>
    %2 = vector.shape_cast %1 : vector<2x128xf32> to vector<2x1x128xf32>
    %cst_2 = arith.constant 4.000000e+00 : f32
    %3 = vector.broadcast %cst_2 : f32 to vector<2x1x128xf32>
    %4 = arith.divf %2, %3 : vector<2x1x128xf32>
    %5 = vector.broadcast %4 : vector<2x1x128xf32> to vector<2x4x128xf32>
    %6 = arith.subf %0, %5 : vector<2x4x128xf32>
    %7 = arith.mulf %6, %6 : vector<2x4x128xf32>
    %cst_3 = arith.constant dense<0.000000e+00> : vector<2x128xf32>
    %8 = vector.multi_reduction <add>, %7, %cst_3 [1] : vector<2x4x128xf32> to vector<2x128xf32>
    %9 = vector.shape_cast %8 : vector<2x128xf32> to vector<2x1x128xf32>
    %cst_4 = arith.constant 4.000000e+00 : f32
    %10 = vector.broadcast %cst_4 : f32 to vector<2x1x128xf32>
    %11 = arith.divf %9, %10 : vector<2x1x128xf32>
    %cst_5 = arith.constant 9.99999974E-6 : f32
    %12 = vector.broadcast %cst_5 : f32 to vector<2x1x128xf32>
    %13 = arith.addf %11, %12 : vector<2x1x128xf32>
    %14 = math.rsqrt %13 : vector<2x1x128xf32>
    %15 = vector.broadcast %14 : vector<2x1x128xf32> to vector<2x4x128xf32>
    %16 = arith.mulf %6, %15 : vector<2x4x128xf32>
    %c0_6 = arith.constant 0 : index
    %c0_7 = arith.constant 0 : index
    %c0_8 = arith.constant 0 : index
    %17 = vector.load %arg3[%c0_6, %c0_7, %c0_8] : memref<1x4x1xf32, #tpu.memory_space<vmem>>, vector<1x4x1xf32>
    %18 = vector.broadcast %17 : vector<1x4x1xf32> to vector<2x4x128xf32>
    %19 = arith.mulf %16, %18 : vector<2x4x128xf32>
    %c0_9 = arith.constant 0 : index
    %c0_10 = arith.constant 0 : index
    %c0_11 = arith.constant 0 : index
    %20 = vector.load %arg4[%c0_9, %c0_10, %c0_11] : memref<1x4x1xf32, #tpu.memory_space<vmem>>, vector<1x4x1xf32>
    %21 = vector.broadcast %20 : vector<1x4x1xf32> to vector<2x4x128xf32>
    %22 = arith.addf %19, %21 : vector<2x4x128xf32>
    %c0_12 = arith.constant 0 : index
    %c0_13 = arith.constant 0 : index
    %c0_14 = arith.constant 0 : index
    %23 = vector.load %arg5[%c0_12, %c0_13, %c0_14] : memref<2x4x128xf32, #tpu.memory_space<vmem>>, vector<2x4x128xf32>
    tpu.vector_store %arg5[%c0_12, %c0_13, %c0_14], %22 {strides = array<i32>} : memref<2x4x128xf32, #tpu.memory_space<vmem>>, vector<2x4x128xf32>,
    return
  }
  func.func @transform_0(%arg0: i32, %arg1: i32) -> (i32, i32, i32) {
    %c0_i32 = arith.constant 0 : i32
    %c0_i32_0 = arith.constant 0 : i32
    return %arg0, %c0_i32, %arg1 : i32, i32, i32
  }
  func.func @transform_1(%arg0: i32, %arg1: i32) -> (i32, i32, i32) {
    %c0_i32 = arith.constant 0 : i32
    %c0_i32_0 = arith.constant 0 : i32
    %c0_i32_1 = arith.constant 0 : i32
    %c0_i32_2 = arith.constant 0 : i32
    return %c0_i32, %c0_i32_0, %c0_i32_1 : i32, i32, i32
  }
  func.func @transform_2(%arg0: i32, %arg1: i32) -> (i32, i32, i32) {
    %c0_i32 = arith.constant 0 : i32
    %c0_i32_0 = arith.constant 0 : i32
    %c0_i32_1 = arith.constant 0 : i32
    %c0_i32_2 = arith.constant 0 : i32
    return %c0_i32, %c0_i32_0, %c0_i32_1 : i32, i32, i32
  }
  func.func @transform_3(%arg0: i32, %arg1: i32) -> (i32, i32, i32) {
    %c0_i32 = arith.constant 0 : i32
    %c0_i32_0 = arith.constant 0 : i32
    return %arg0, %c0_i32, %arg1 : i32, i32, i32
  }
}

</mosaic_0001>

<bundles_post_ra>
// kernel: tpu_custom_call.1
= control target key start
LH: loop header
LB: loop body
LE: loop exit
PB: predicated region body
PF: predicated region fallthrough
CT: control target
= control target key end

     0   :  { %v159_v1 = vmov 0   ;;  %s203_s0 = inlined_call_operand.vmem [shape: f32[2,4,128], index: 0, kind: input, shape index: {}]   ;;  %s204_s1 = inlined_call_operand.vmem [shape: f32[1,4,1], index: 1, kind: input, shape index: {}]   ;;  %s205_s2 = inlined_call_operand.vmem [shape: f32[1,4,1], index: 2, kind: input, shape index: {}]   ;;  %s206_s3 = inlined_call_operand.hbm [shape: f32[2,4,128], index: 3, kind: output, shape index: {}]  }
   0x1   :  { %v85_v0 = vld [vmem:[%s204_s1] sm:$0xf]  ;;  %126 = vset.pattern.permute.xlu0 %v159_v1 }
   0x2   :  { %8 = vsyncpa [#allocation3], 0  ;;  %88 = vperm.xlu0 %126, %v85_v0   ;;  %v93_v2 = vld [vmem:[%s205_s2] sm:$0xf]  ;;  %v160_v3 = vmov 4.0   ;;  %vm17_vm0 = vcmask 1043456  }
   0x3   :  { %127 = vrcp.f32 %v160_v3  ;;  %v15_v4 = vld [vmem:[%s203_s0] sm:$0xf]  ;;  %v16_v5 = vld [vmem:[%s203_s0 + $0x4] sm:$0xf]  ;;  %s161_s0 = smov [#allocation2]   ;;  %s109_s21 = sshll.u32 %s206_s3, 4  ;;  %s110_s21 = int_to_ptr.hbm [resolvable:$true] %s109_s21 }
   0x4   :  { %v18_v6 = vsel %vm17_vm0, %v15_v4, 0.0  ;;  %v25_v7 = vsel %vm17_vm0, %v16_v5, 0.0  ;;  %s107_s1 = sshll.u32 %s161_s0, 4  ;;  %s162_s22 = smov 64   ;;  %s108_s1 = int_to_ptr.vmem [resolvable:$true] %s107_s1 }
   0x5   :  { %v19_v8 = vrot.slane %v18_v6, 4  ;;  %v26_v9 = vrot.slane %v25_v7, 4  ;;  %s163_s23 = smov 4  }
   0x7   :  { %v20_v11 = vadd.f32 %v19_v8, %v18_v6  ;;  %v27_v12 = vadd.f32 %v26_v9, %v25_v7 }
   0x9   :  { %v128_v10 = vpop.eup %127  ;;  %v21_v14 = vrot.slane %v20_v11, 2  ;;  %v28_v15 = vrot.slane %v27_v12, 2 }
   0xa   :  { %96 = vperm.xlu0 %126, %v93_v2   ;;  %v33_v13 = vmul.f32 4.0, %v128_v10  ;;  %vm37_vm1 = vweird.f32 %v128_v10 }
   0xb   :  { %v22_v17 = vadd.f32 %v21_v14, %v20_v11  ;;  %v29_v18 = vadd.f32 %v28_v15, %v27_v12 }
   0xc   :  { %v34_v16 = vsub.f32 1.0, %v33_v13 }
   0xd   :  { %v23_v20 = vrot.slane %v22_v17, 1  ;;  %v30_v21 = vrot.slane %v29_v18, 1 }
   0xe   :  { %v35_v19 = vmul.f32 %v128_v10, %v34_v16 }
   0xf   :  { %v24_v23 = vadd.f32 %v23_v20, %v22_v17  ;;  %v31_v24 = vadd.f32 %v30_v21, %v29_v18 }
  0x10   :  { %v36_v22 = vadd.f32 %v128_v10, %v35_v19 }
  0x12   :  { %v38_v25 = vsel %vm37_vm1, %v128_v10, %v36_v22 }
  0x13   :  { %v39_v26 = vmul.f32 %v38_v25, %v24_v23  ;;  %v40_v27 = vmul.f32 %v38_v25, %v31_v24 }
  0x15   :  { %v41_v28 = vsub.f32 %v15_v4, %v39_v26  ;;  %v42_v29 = vsub.f32 %v16_v5, %v40_v27 }
  0x17   :  { %v43_v30 = vmul.f32 %v41_v28, %v41_v28  ;;  %v44_v31 = vmul.f32 %v42_v29, %v42_v29 }
  0x19   :  { %v45_v32 = vsel %vm17_vm0, %v43_v30, 0.0  ;;  %v52_v33 = vsel %vm17_vm0, %v44_v31, 0.0 }
  0x1a   :  { %v46_v34 = vrot.slane %v45_v32, 4  ;;  %v53_v35 = vrot.slane %v52_v33, 4 }
  0x1c   :  { %v47_v36 = vadd.f32 %v46_v34, %v45_v32  ;;  %v54_v37 = vadd.f32 %v53_v35, %v52_v33 }
  0x1e   :  { %v48_v38 = vrot.slane %v47_v36, 2  ;;  %v55_v39 = vrot.slane %v54_v37, 2 }
  0x20   :  { %v49_v40 = vadd.f32 %v48_v38, %v47_v36  ;;  %v56_v41 = vadd.f32 %v55_v39, %v54_v37 }
  0x22   :  { %v50_v42 = vrot.slane %v49_v40, 1  ;;  %v57_v43 = vrot.slane %v56_v41, 1 }
  0x24   :  { %v51_v44 = vadd.f32 %v50_v42, %v49_v40  ;;  %v58_v45 = vadd.f32 %v57_v43, %v56_v41 }
  0x26   :  { %v59_v46 = vmul.f32 %v51_v44, %v38_v25  ;;  %v60_v47 = vmul.f32 %v58_v45, %v38_v25 }
  0x28   :  { %v61_v48 = vadd.f32 1e-05, %v59_v46  ;;  %v62_v49 = vadd.f32 1e-05, %v60_v47 }
  0x2a   :  { %129 = vrsqrt.f32 %v61_v48  ;;  %vm69_vm2 = vweird.f32 %v61_v48  ;;  %vm79_vm4 = vweird.f32 %v62_v49 }
  0x2b   :  { %131 = vrsqrt.f32 %v62_v49 }
  0x30   :  { %v130_v50 = vpop.eup %129 }
  0x31   :  { %v132_v51 = vpop.eup %131  ;;  %v64_v52 = vmul.f32 %v130_v50, %v61_v48  ;;  %vm70_vm3 = vweird.f32 %v130_v50 }
  0x32   :  { %v74_v53 = vmul.f32 %v132_v51, %v62_v49  ;;  %vm80_vm5 = vweird.f32 %v132_v51  ;;  %vm71_vm6 = vmor %vm69_vm2, %vm70_vm3 }
  0x33   :  { %v65_v54 = vmul.f32 %v130_v50, %v64_v52  ;;  %vm81_vm7 = vmor %vm79_vm4, %vm80_vm5 }
  0x34   :  { %v75_v55 = vmul.f32 %v132_v51, %v74_v53 }
  0x35   :  { %v66_v56 = vmul.f32 0.5, %v65_v54 }
  0x36   :  { %v76_v57 = vmul.f32 0.5, %v75_v55 }
  0x37   :  { %v67_v58 = vsub.f32 1.5, %v66_v56 }
  0x38   :  { %v77_v59 = vsub.f32 1.5, %v76_v57 }
  0x39   :  { %v68_v60 = vmul.f32 %v130_v50, %v67_v58 }
  0x3a   :  { %v78_v61 = vmul.f32 %v132_v51, %v77_v59 }
  0x3b   :  { %v72_v63 = vsel %vm71_vm6, %v130_v50, %v68_v60 }
  0x3c   :  { %v82_v0 = vsel %vm81_vm7, %v132_v51, %v78_v61  ;;  %v83_v1 = vmul.f32 %v72_v63, %v41_v28 }
  0x3d   :  { %v84_v2 = vmul.f32 %v82_v0, %v42_v29 }
  0x74   :  { %v89_v62 = vpop.permute.xlu0 %88 }
  0x75   :  { %v91_v3 = vmul.f32 %v89_v62, %v83_v1  ;;  %v92_v4 = vmul.f32 %v89_v62, %v84_v2 }
  0x7c   :  { %v97_v5 = vpop.permute.xlu0 %96 }
  0x7d   :  { %v99_v6 = vadd.f32 %v97_v5, %v91_v3  ;;  %v100_v7 = vadd.f32 %v97_v5, %v92_v4 }
  0x7f   :  { %101 = vst [vmem:[#allocation2] sm:$0xf] %v99_v6 }
  0x80   :  { %102 = vst [vmem:[#allocation2 + $0x4] sm:$0xf] %v100_v7 }
  0x81   :  { %115 = dma.vmem_to_hbm [thread:$0]  %s108_s1, 128, %s110_s21, [#allocation3], %s162_s22, %s162_s22, %s163_s23  }
  0x82   :  { %157 = dma.done.wait [#allocation3], 128  }
  0x83   :  { %158 = vsyncadd [#allocation3], 4294967168 }
  0x84   :  { %120 = vsyncpa [#allocation3], 1 }

</bundles_post_ra>
